<compile_context>
chip_gen: v7x
topology: tpu7x:2x2x1
jax: 0.10.0
libtpu: 0.0.40
codegen_flags: <defaults>
</compile_context>

<pallas_src>
import functools

import jax
import jax.numpy as jnp
from jax.experimental import pallas as pl
from jax.experimental.pallas import tpu as pltpu


def _ce_loss_kernel(pred_ref, label_ref, out_ref, acc_ref, *, n_valid,
                    block_rows, blocks_per_partial, num_classes):
    # pred_ref:  (T_N, C)       logits block, native dtype (f32 or bf16)
    # label_ref: (T_N, 1)       int32 class ids (already binned + clamped)
    # out_ref:   (1, 1, 1)      f32 partial sum (one per "parallel" slice)
    # acc_ref:   (T_N, 1) VMEM  f32 per-row accumulator, resident across blocks
    blk = pl.program_id(1)

    @pl.when(blk == 0)
    def _init():
        acc_ref[...] = jnp.zeros_like(acc_ref)

    logits = pred_ref[...]                                  # (T_N, C) native
    labels = label_ref[...]                                 # (T_N, 1) int32

    # Row max in the native dtype (bf16 VALU on v6e/v7x; lowers to f32 on v5e).
    row_max = jnp.max(logits, axis=-1, keepdims=True)       # (T_N, 1)

    # Upcast only for exp + accumulation: numerically stable logsumexp in f32.
    shifted = logits.astype(jnp.float32) - row_max.astype(jnp.float32)
    sum_exp = jnp.sum(jnp.exp(shifted), axis=-1, keepdims=True)   # (T_N, 1)

    # One-hot pick of the true-class logit (no dynamic gather on TPU).
    # (1, C) iota broadcasts against (T_N, 1) labels; selecting from `shifted`
    # makes the row max cancel:  lse - x_y = log(sum_exp) - (x_y - max).
    col_ids = jax.lax.broadcasted_iota(jnp.int32, (1, num_classes), 1)
    picked_shifted = jnp.sum(jnp.where(col_ids == labels, shifted, 0.0),
                             axis=-1, keepdims=True)              # (T_N, 1)

    contrib = jnp.log(sum_exp) - picked_shifted                   # (T_N, 1) f32

    # Mask rows beyond the true batch size -- but only on block(s) that
    # actually contain padded rows; all other blocks skip the iota/compare.
    block_start = (pl.program_id(0) * blocks_per_partial + blk) * block_rows
    has_padding = block_start + block_rows > n_valid

    @pl.when(has_padding)
    def _acc_masked():
        row_ids = block_start + jax.lax.broadcasted_iota(
            jnp.int32, (block_rows, 1), 0)
        acc_ref[...] += jnp.where(row_ids < n_valid, contrib, 0.0)

    @pl.when(jnp.logical_not(has_padding))
    def _acc():
        acc_ref[...] += contrib

    # Single cross-sublane reduce + scalar-layout store per partial.
    @pl.when(blk == blocks_per_partial - 1)
    def _finalize():
        out_ref[...] = jnp.zeros_like(out_ref) + jnp.sum(acc_ref[...])


def _nll_mean(logits, labels):
    """Pure-JAX cross-entropy (mean) given already-binned labels."""
    logp = jax.nn.log_softmax(logits.astype(jnp.float32), axis=-1)
    nll = -jnp.take_along_axis(logp, labels[:, None], axis=-1)[:, 0]
    return jnp.mean(nll)


def _vmem_limit_bytes():
    # 64 MiB on 128-MiB-VMEM parts (v5e/v6e), ~48 MiB on 64-MiB v7x.
    try:
        cap = pltpu.get_tpu_info().vmem_capacity_bytes
    except Exception:  # conservative fallback (v7x-sized)
        cap = 64 * 1024 * 1024
    return min(64 * 1024 * 1024, (cap * 3) // 4)


def ce_loss(pred, target, value_range, *, block_rows=None, use_pallas=None):
    """Pallas equivalent of CELoss(range)(pred, target).

    pred:   (N, C) float logits (f32 or bf16)
    target: (N,)   integer targets in [0, value_range)
    """
    n, c = pred.shape
    bin_size = value_range // c
    assert bin_size >= 1, "value_range must be >= number of classes"

    # Label binning once in the wrapper (cheap XLA op on an N-vector).
    # Clamp to C-1: if value_range % C != 0 the top bin maps to label == C,
    # which nn.CrossEntropyLoss rejects at runtime; JAX cannot raise, so clamp.
    labels = jnp.clip(target.astype(jnp.int32) // bin_size, 0, c - 1)

    # Tiny problems: fixed pallas_call overhead and <128-lane vregs dominate;
    # use the fused XLA path instead.
    if use_pallas is None:
        use_pallas = (n * c >= 32768) and (c >= 8)
    if not use_pallas:
        return _nll_mean(pred, labels)

    labels2d = labels.reshape(n, 1)

    itemsize = jnp.dtype(pred.dtype).itemsize
    # Sublane packing: multiples of 8 for f32, 16 for bf16, 32 for int8/fp8.
    mult = max(8, 32 // itemsize)
    vmem_limit = _vmem_limit_bytes()

    if block_rows is None:
        # Live bytes per row: 2x double-buffered native input block
        # + ~3x f32 intermediates (shifted / exp / select) + f32 accumulator.
        per_row = c * (2 * itemsize + 3 * 4) + 4
        block_rows = int(vmem_limit * 0.7) // max(per_row, 1)
        block_rows = max(mult, min(block_rows, 32768))
    block_rows = max(mult, (block_rows // mult) * mult)
    block_rows = min(block_rows, -(-n // mult) * mult)

    n_blocks = -(-n // block_rows)
    # Two partial sums so v7x's two TensorCores can each take half of the row
    # blocks; serializes harmlessly on single-core v5e/v6e.
    num_partials = 2 if n_blocks >= 2 else 1
    blocks_per_partial = -(-n_blocks // num_partials)
    padded_n = num_partials * blocks_per_partial * block_rows

    if padded_n != n:
        pred = jnp.pad(pred, ((0, padded_n - n), (0, 0)))
        labels2d = jnp.pad(labels2d, ((0, padded_n - n), (0, 0)))

    kernel = functools.partial(
        _ce_loss_kernel,
        n_valid=n,
        block_rows=block_rows,
        blocks_per_partial=blocks_per_partial,
        num_classes=c,
    )

    partials = pl.pallas_call(
        kernel,
        out_shape=jax.ShapeDtypeStruct((num_partials, 1, 1), jnp.float32),
        grid=(num_partials, blocks_per_partial),
        in_specs=[
            pl.BlockSpec((block_rows, c),
                         lambda p, i: (p * blocks_per_partial + i, 0)),
            pl.BlockSpec((block_rows, 1),
                         lambda p, i: (p * blocks_per_partial + i, 0)),
        ],
        out_specs=pl.BlockSpec((1, 1, 1), lambda p, i: (p, 0, 0)),
        scratch_shapes=[pltpu.VMEM((block_rows, 1), jnp.float32)],
        compiler_params=pltpu.CompilerParams(
            dimension_semantics=("parallel", "arbitrary"),
            vmem_limit_bytes=vmem_limit,
        ),
    )(pred, labels2d)

    # Finish the mean over the true batch size in the wrapper.
    return jnp.sum(partials) / n


def ce_loss_ref(pred, target, value_range):
    """Pure-JAX reference for verification."""
    c = pred.shape[1]
    bin_size = value_range // c
    labels = jnp.clip(target.astype(jnp.int32) // bin_size, 0, c - 1)
    return _nll_mean(pred, labels)


if __name__ == "__main__":
    key = jax.random.PRNGKey(0)
    k_pred, k_tgt, k_pred2, k_tgt2 = jax.random.split(key, 4)

    # --- Test 1: tiny shape matching the module's toy usage (f32); kernel
    # forced so the Pallas path is exercised even below the fast-path cutoff.
    N, C, VALUE_RANGE = 8, 4, 256
    pred = jax.random.normal(k_pred, (N, C), dtype=jnp.float32)
    target = jax.random.randint(k_tgt, (N,), 0, VALUE_RANGE, dtype=jnp.int32)
    loss = jax.block_until_ready(
        ce_loss(pred, target, VALUE_RANGE, use_pallas=True))
    ref = ce_loss_ref(pred, target, VALUE_RANGE)
    assert jnp.allclose(loss, ref, atol=1e-5, rtol=1e-5), (loss, ref)

    # --- Test 2: bf16 logits, ragged N, multi-block grid + 2 partials,
    # explicit small block_rows so both masked and unmasked paths run.
    N2, C2, VALUE_RANGE2 = 300, 128, 1024
    pred2 = jax.random.normal(k_pred2, (N2, C2), dtype=jnp.float32).astype(
        jnp.bfloat16)
    target2 = jax.random.randint(k_tgt2, (N2,), 0, VALUE_RANGE2,
                                 dtype=jnp.int32)
    loss2 = jax.block_until_ready(
        ce_loss(pred2, target2, VALUE_RANGE2, block_rows=64, use_pallas=True))
    ref2 = ce_loss_ref(pred2, target2, VALUE_RANGE2)
    assert jnp.allclose(loss2, ref2, atol=1e-4, rtol=1e-4), (loss2, ref2)

    # --- Test 3: auto, generation-aware block sizing + fast-path routing.
    loss3 = jax.block_until_ready(ce_loss(pred2, target2, VALUE_RANGE2))
    assert jnp.allclose(loss3, ref2, atol=1e-4, rtol=1e-4), (loss3, ref2)

    print("KERNEL_OK")
</pallas_src>

<mosaic_0001>
module attributes {stable_mosaic.version = 11 : i64} {
  func.func @_ce_loss_kernel(%arg0: i32, %arg1: i32, %arg2: memref<8x4xf32, #tpu.memory_space<vmem>>, %arg3: memref<8x1xi32, #tpu.memory_space<vmem>>, %arg4: memref<1x1x1xf32, #tpu.memory_space<vmem>>, %arg5: memref<8x1xf32, #tpu.memory_space<vmem>>) attributes {dimension_semantics = [#tpu.dimension_semantics<parallel>, #tpu.dimension_semantics<arbitrary>], iteration_bounds = array<i64: 1, 1>, scalar_prefetch = 0 : i64, scratch_operands = 1 : i64, tpu.core_type = #tpu.core_type<tc>, window_params = [{transform_indices = @transform_0, window_bounds = array<i64: 8, 4>}, {transform_indices = @transform_1, window_bounds = array<i64: 8, 1>}, {transform_indices = @transform_2, window_bounds = array<i64: 1, 1, 1>}]} {
    %c0_i32 = arith.constant 0 : i32
    %0 = arith.cmpi eq, %arg1, %c0_i32 : i32
    %1 = arith.extui %0 : i1 to i32
    %c0_i32_0 = arith.constant 0 : i32
    %2 = arith.cmpi ne, %1, %c0_i32_0 : i32
    scf.if %2 {
      %cst_13 = arith.constant 0.000000e+00 : f32
      %35 = vector.broadcast %cst_13 : f32 to vector<8x1xf32>
      %c0_14 = arith.constant 0 : index
      %c0_15 = arith.constant 0 : index
      %36 = vector.load %arg5[%c0_14, %c0_15] : memref<8x1xf32, #tpu.memory_space<vmem>>, vector<8x1xf32>
      tpu.vector_store %arg5[%c0_14, %c0_15], %35 {strides = array<i32>} : memref<8x1xf32, #tpu.memory_space<vmem>>, vector<8x1xf32>,
    } else {
    }
    %c0 = arith.constant 0 : index
    %c0_1 = arith.constant 0 : index
    %3 = vector.load %arg2[%c0, %c0_1] : memref<8x4xf32, #tpu.memory_space<vmem>>, vector<8x4xf32>
    %c0_2 = arith.constant 0 : index
    %c0_3 = arith.constant 0 : index
    %4 = vector.load %arg3[%c0_2, %c0_3] : memref<8x1xi32, #tpu.memory_space<vmem>>, vector<8x1xi32>
    %cst = arith.constant dense<0xFF800000> : vector<8xf32>
    %5 = vector.multi_reduction <maximumf>, %3, %cst [1] : vector<8x4xf32> to vector<8xf32>
    %6 = vector.shape_cast %5 : vector<8xf32> to vector<8x1xf32>
    %7 = vector.broadcast %6 : vector<8x1xf32> to vector<8x4xf32>
    %8 = arith.subf %3, %7 : vector<8x4xf32>
    %9 = math.exp %8 : vector<8x4xf32>
    %cst_4 = arith.constant dense<0.000000e+00> : vector<8xf32>
    %10 = vector.multi_reduction <add>, %9, %cst_4 [1] : vector<8x4xf32> to vector<8xf32>
    %11 = vector.shape_cast %10 : vector<8xf32> to vector<8x1xf32>
    %12 = tpu.iota {dimensions = array<i32: 1>} : vector<1x4xi32>
    %13 = vector.broadcast %12 : vector<1x4xi32> to vector<8x4xi32>
    %14 = vector.broadcast %4 : vector<8x1xi32> to vector<8x4xi32>
    %15 = arith.cmpi eq, %13, %14 : vector<8x4xi32>
    %cst_5 = arith.constant 0.000000e+00 : f32
    %16 = vector.broadcast %cst_5 : f32 to vector<8x4xf32>
    %17 = arith.select %15, %8, %16 : vector<8x4xi1>, vector<8x4xf32>
    %cst_6 = arith.constant dense<0.000000e+00> : vector<8xf32>
    %18 = vector.multi_reduction <add>, %17, %cst_6 [1] : vector<8x4xf32> to vector<8xf32>
    %19 = vector.shape_cast %18 : vector<8xf32> to vector<8x1xf32>
    %20 = math.log %11 : vector<8x1xf32>
    %21 = arith.subf %20, %19 : vector<8x1xf32>
    %c1_i32 = arith.constant 1 : i32
    %22 = arith.muli %arg0, %c1_i32 : i32
    %23 = arith.addi %22, %arg1 : i32
    %c8_i32 = arith.constant 8 : i32
    %24 = arith.muli %23, %c8_i32 : i32
    %c8_i32_7 = arith.constant 8 : i32
    %25 = arith.addi %24, %c8_i32_7 : i32
    %c8_i32_8 = arith.constant 8 : i32
    %26 = arith.cmpi sgt, %25, %c8_i32_8 : i32
    %27 = arith.extui %26 : i1 to i32
    %c0_i32_9 = arith.constant 0 : i32
    %28 = arith.cmpi ne, %27, %c0_i32_9 : i32
    scf.if %28 {
      %35 = tpu.iota {dimensions = array<i32: 0>} : vector<8x1xi32>
      %36 = vector.broadcast %24 : i32 to vector<8x1xi32>
      %37 = arith.addi %36, %35 : vector<8x1xi32>
      %c0_13 = arith.constant 0 : index
      %c0_14 = arith.constant 0 : index
      %38 = vector.load %arg5[%c0_13, %c0_14] : memref<8x1xf32, #tpu.memory_space<vmem>>, vector<8x1xf32>
      %c8_i32_15 = arith.constant 8 : i32
      %39 = vector.broadcast %c8_i32_15 : i32 to vector<8x1xi32>
      %40 = arith.cmpi slt, %37, %39 : vector<8x1xi32>
      %cst_16 = arith.constant 0.000000e+00 : f32
      %41 = vector.broadcast %cst_16 : f32 to vector<8x1xf32>
      %42 = arith.select %40, %21, %41 : vector<8x1xi1>, vector<8x1xf32>
      %43 = arith.addf %38, %42 : vector<8x1xf32>
      %c0_17 = arith.constant 0 : index
      %c0_18 = arith.constant 0 : index
      %44 = vector.load %arg5[%c0_17, %c0_18] : memref<8x1xf32, #tpu.memory_space<vmem>>, vector<8x1xf32>
      tpu.vector_store %arg5[%c0_17, %c0_18], %43 {strides = array<i32>} : memref<8x1xf32, #tpu.memory_space<vmem>>, vector<8x1xf32>,
    } else {
    }
    %true = arith.constant true
    %29 = arith.xori %26, %true : i1
    %30 = arith.extui %29 : i1 to i32
    %c0_i32_10 = arith.constant 0 : i32
    %31 = arith.cmpi ne, %30, %c0_i32_10 : i32
    scf.if %31 {
      %c0_13 = arith.constant 0 : index
      %c0_14 = arith.constant 0 : index
      %35 = vector.load %arg5[%c0_13, %c0_14] : memref<8x1xf32, #tpu.memory_space<vmem>>, vector<8x1xf32>
      %36 = arith.addf %35, %21 : vector<8x1xf32>
      %c0_15 = arith.constant 0 : index
      %c0_16 = arith.constant 0 : index
      %37 = vector.load %arg5[%c0_15, %c0_16] : memref<8x1xf32, #tpu.memory_space<vmem>>, vector<8x1xf32>
      tpu.vector_store %arg5[%c0_15, %c0_16], %36 {strides = array<i32>} : memref<8x1xf32, #tpu.memory_space<vmem>>, vector<8x1xf32>,
    } else {
    }
    %c0_i32_11 = arith.constant 0 : i32
    %32 = arith.cmpi eq, %arg1, %c0_i32_11 : i32
    %33 = arith.extui %32 : i1 to i32
    %c0_i32_12 = arith.constant 0 : i32
    %34 = arith.cmpi ne, %33, %c0_i32_12 : i32
    scf.if %34 {
      %cst_13 = arith.constant 0.000000e+00 : f32
      %35 = vector.broadcast %cst_13 : f32 to vector<1x1x1xf32>
      %c0_14 = arith.constant 0 : index
      %c0_15 = arith.constant 0 : index
      %36 = vector.load %arg5[%c0_14, %c0_15] : memref<8x1xf32, #tpu.memory_space<vmem>>, vector<8x1xf32>
      %37 = vector.shape_cast %36 : vector<8x1xf32> to vector<1x8x1xf32>
      %cst_16 = arith.constant dense<0.000000e+00> : vector<1xf32>
      %38 = vector.multi_reduction <add>, %37, %cst_16 [1, 2] : vector<1x8x1xf32> to vector<1xf32>
      %39 = vector.shape_cast %38 : vector<1xf32> to vector<1x1x1xf32>
      %40 = vector.extract %39[0, 0, 0] : f32 from vector<1x1x1xf32>
      %41 = vector.broadcast %40 : f32 to vector<1x1x1xf32>
      %42 = arith.addf %35, %41 : vector<1x1x1xf32>
      %c0_17 = arith.constant 0 : index
      %c0_18 = arith.constant 0 : index
      %c0_19 = arith.constant 0 : index
      %43 = vector.load %arg4[%c0_17, %c0_18, %c0_19] : memref<1x1x1xf32, #tpu.memory_space<vmem>>, vector<1x1x1xf32>
      tpu.vector_store %arg4[%c0_17, %c0_18, %c0_19], %42 {strides = array<i32>} : memref<1x1x1xf32, #tpu.memory_space<vmem>>, vector<1x1x1xf32>,
    } else {
    }
    return
  }
  func.func @transform_0(%arg0: i32, %arg1: i32) -> (i32, i32) {
    %c1_i32 = arith.constant 1 : i32
    %0 = arith.muli %arg0, %c1_i32 : i32
    %1 = arith.addi %0, %arg1 : i32
    %c0_i32 = arith.constant 0 : i32
    %c0_i32_0 = arith.constant 0 : i32
    return %1, %c0_i32 : i32, i32
  }
  func.func @transform_1(%arg0: i32, %arg1: i32) -> (i32, i32) {
    %c1_i32 = arith.constant 1 : i32
    %0 = arith.muli %arg0, %c1_i32 : i32
    %1 = arith.addi %0, %arg1 : i32
    %c0_i32 = arith.constant 0 : i32
    %c0_i32_0 = arith.constant 0 : i32
    return %1, %c0_i32 : i32, i32
  }
  func.func @transform_2(%arg0: i32, %arg1: i32) -> (i32, i32, i32) {
    %c0_i32 = arith.constant 0 : i32
    %c0_i32_0 = arith.constant 0 : i32
    %c0_i32_1 = arith.constant 0 : i32
    return %arg0, %c0_i32, %c0_i32_0 : i32, i32, i32
  }
}

</mosaic_0001>

<bundles_post_ra>
// kernel: tpu_custom_call.1
= control target key start
LH: loop header
LB: loop body
LE: loop exit
PB: predicated region body
PF: predicated region fallthrough
CT: control target
= control target key end

     0   :  { %vm54_vm0 = vcmask 31744   ;;  %s220_s0 = inlined_call_operand.vmem [shape: f32[8,4], index: 0, kind: input, shape index: {}]   ;;  %s221_s1 = inlined_call_operand.vmem [shape: s32[8,1], index: 1, kind: input, shape index: {}]   ;;  %s222_s2 = inlined_call_operand.hbm [shape: f32[1,1,1], index: 2, kind: output, shape index: {}]  }
   0x1   :  { %v52_v0 = vld [vmem:[%s220_s0] sm:$0xff] }
   0x2   :  { %7 = vsyncpa [#allocation4], 0  ;;  %v55_v1 = vsel %vm54_vm0, %v52_v0, -inf  ;;  %v181_v2 = vmov 0   ;;  %v53_v3 = vld [vmem:[%s221_s1] sm:$0xff]  ;;  %v64_v7 = vlaneseq  ;;  %vm50_vm2 = vcmask 7168  }
   0x3   :  { %152 = vset.pattern.permute.xlu0 %v181_v2  ;;  %v182_v14 = vmov 0.0   ;;  %s183_s0 = smov [#allocation3]   ;;  %vm119_vm3 = vcmask 0  }
   0x4   :  { %56 = vmax.xlane.f32.xlu0 %v55_v1  ;;  %v65_v8 = vand.u32 127, %v64_v7  ;;  %51 = vst.msk [vmem:[#allocation2] sm:$0xff] %vm50_vm2, %v182_v14  ;;  %s127_s1 = sshll.u32 %s183_s0, 4  ;;  %s128_s1 = int_to_ptr.vmem [resolvable:$true] %s127_s1 }
   0x5   :  { %s157_s14 = scalar_lea.vmem %s128_s1, 16  ;;  %s161_s15 = scalar_lea.vmem %s128_s1, 32 }
   0x6   :  { %p158_p0 = scmp.ne.s32.totalorder %s128_s1, %s157_s14  ;;  %p162_p1 = scmp.lt.s32.totalorder %s128_s1, %s128_s1 }
   0x7   :  { %p163_p2 = scmp.lt.s32.totalorder %s161_s15, %s157_s14 }
   0x9   :  { %p164_p3 = por %p163_p2, %p162_p1 }
   0xb   :  { %v98_v19 = vld [vmem:[#allocation2] sm:$0xff]  ;;  %p165_p4 = pnand %p164_p3, %p158_p0 }
  0x1a   :  { %67 = vperm.xlu0 %152, %v53_v3  }
  0x91   :  { %v57_v4 = vpop.xlane.xlu0 %56 }
  0x92   :  { %v58_v5 = vsub.f32 %v52_v0, %v57_v4 }
  0x94   :  { %v59_v6 = vmul.f32 1.442695, %v58_v5 }
  0x96   :  { %153 = vpow2.f32 %v59_v6 }
  0x99   :  { %v68_v9 = vpop.permute.xlu0 %67 }
  0x9a   :  { %vm69_vm1 = vcmp.eq.s32.totalorder %v65_v8, %v68_v9 }
  0x9b   :  { %v70_v12 = vsel %vm69_vm1, %v58_v5, 0.0 }
  0x9c   :  { %v71_v13 = vsel %vm54_vm0, %v70_v12, 0.0 }
  0xa0   :  { %v154_v10 = vpop.eup %153 }
  0xa1   :  { %v61_v11 = vsel %vm54_vm0, %v154_v10, 0.0 }
  0xa2   :  { %62 = vadd.xlane.f32.xlu1 %v61_v11 }
  0xa6   :  { %72 = vadd.xlane.f32.xlu1 %v71_v13 }
 0x12f   :  { %v63_v15 = vpop.xlane.xlu1 %62 }
 0x130   :  { %155 = vlog2.f32 %v63_v15 }
 0x133   :  { %v73_v18 = vpop.xlane.xlu1 %72 }
 0x13a   :  { %v156_v16 = vpop.eup %155 }
 0x13b   :  { %v75_v17 = vmul.f32 0.6931472, %v156_v16 }
 0x13d   :  { %v76_v20 = vsub.f32 %v75_v17, %v73_v18 }
 0x13f   :  { %v99_v21 = vadd.f32 %v98_v19, %v76_v20 }
 0x141   :  { %101 = vst.msk [vmem:[#allocation2] sm:$0xff] %vm50_vm2, %v99_v21 }
 0x148   :  { %v105_v22 = vld [vmem:[#allocation2] sm:$0xff] }
 0x149   :  { %v107_v23 = vsel %vm50_vm2, %v105_v22, 0.0 }
 0x14a   :  { %108 = vadd.xlane.f32.xlu1 %v107_v23 }
 0x1d7   :  { %v109_v24 = vpop.xlane.xlu1 %108 }
 0x1d8   :  { %v110_v25 = vrot.slane %v109_v24, 4 }
 0x1da   :  { %v111_v26 = vadd.f32 %v110_v25, %v109_v24 }
 0x1dc   :  { %v112_v27 = vrot.slane %v111_v26, 2 }
 0x1de   :  { %v113_v28 = vadd.f32 %v112_v27, %v111_v26 }
 0x1e0   :  { %v114_v29 = vrot.slane %v113_v28, 1 }
 0x1e2   :  { %v115_v30 = vadd.f32 %v114_v29, %v113_v28 }
 0x1e4   :  { %147 = vpush %v115_v30 }
 0x215   :  { %s148_s13 = spop %147 }
 0x216   :  { %v117_v31 = vstv %s148_s13 }
 0x217   :  { %120 = vst.msk [vmem:[#allocation3] sm:$0x1] %vm119_vm3, %v117_v31 }
 0x218   :  { %168 = shalt.err (!%p165_p4)
}
 0x219   :  { %s169_s18 = scalar_lea.hbm %s222_s2, 16 }
 0x21a   :  { %p170_p5 = scmp.ne.s32.totalorder %s222_s2, %s169_s18  ;;  %p173_p6 = scmp.lt.u32.totalorder %s169_s18, %s222_s2 }
 0x21c   :  { %p175_p7 = pnand %p173_p6, %p170_p5 }
 0x21e   :  { %178 = shalt.err (!%p175_p7)
}
 0x21f   :  { %130 = dma.vmem_to_hbm [thread:$0]  %s128_s1, 16, %s222_s2, [#allocation4]  }
 0x220   :  { %179 = dma.done.wait [#allocation4], 16  }
 0x221   :  { %180 = vsyncadd [#allocation4], 4294967280 }
 0x222   :  { %134 = vsyncpa [#allocation4], 1 }

</bundles_post_ra>
